<compile_context>
chip_gen: v6e
topology: v6e:2x2x1
jax: 0.10.0
libtpu: 0.0.40
codegen_flags: <defaults>
</compile_context>

<pallas_src>
import jax
import jax.numpy as jnp
from jax.experimental import pallas as pl
from jax.experimental.pallas import tpu as pltpu


def _make_interp_kernel(D1, D2, c_in_pad):
    c_in = D1 + D2

    def kernel(xyz1_ref, xyz2t_ref, p1_ref, p2_ref, out_ref):
        x1 = xyz1_ref[0]          # [3, tn]   query points, N-tile on lanes
        x2t = xyz2t_ref[0]        # [S, 3]    source points (pre-transposed)
        S = x2t.shape[0]
        tn = x1.shape[1]

        # Squared pairwise distances in [S, tn] (N stays lane-dense):
        #   d2[s, n] = ||x2_s||^2 + ||x1_n||^2 - 2 * <x2_s, x1_n>
        # The cross term is an MXU matmul; clamp tiny negative cancellation.
        cross = jnp.dot(x2t, x1, preferred_element_type=jnp.float32)   # [S, tn]
        x1sq = jnp.sum(x1 * x1, axis=0, keepdims=True)                 # [1, tn]
        x2sq = jnp.sum(x2t * x2t, axis=1, keepdims=True)               # [S, 1]
        d2 = jnp.maximum(x2sq + x1sq - 2.0 * cross, 0.0)               # [S, tn]

        big = jnp.float32(1e30)
        iota_s = jax.lax.broadcasted_iota(jnp.int32, (S, tn), 0)
        wsum = jnp.zeros((1, tn), jnp.float32)
        wmat = jnp.zeros((S, tn), jnp.float32)
        # TODO(synk): assumes S >= 3, same as PyTorch's three_nn.
        for k in range(3):
            minval = jnp.min(d2, axis=0, keepdims=True)                # [1, tn]
            is_min = d2 <= minval
            first = jnp.min(jnp.where(is_min, iota_s, S),
                            axis=0, keepdims=True)                     # first hit
            onehot = iota_s == first                                   # [S, tn]
            recip = pl.reciprocal(minval + 1e-8, approx=True)          # EUP slot
            wsum = wsum + recip
            wmat = wmat + recip * onehot.astype(jnp.float32)
            if k < 2:
                d2 = jnp.where(onehot, big, d2)   # mask selected entry in place
        wmat = wmat * pl.reciprocal(wsum, approx=True)                 # normalize

        # three_interpolate: interp[c, n] = sum_s points2[c, s] * wmat[s, n]
        interp = jnp.dot(p2_ref[0], wmat,
                         preferred_element_type=jnp.float32)           # [D2, tn]

        # concat(points1, interp) written directly into the padded slab.
        out_ref[0, 0:D1, :] = p1_ref[0]
        out_ref[0, D1:c_in, :] = interp
        if c_in_pad > c_in:
            out_ref[0, c_in:c_in_pad, :] = jnp.zeros(
                (c_in_pad - c_in, tn), jnp.float32)

    return kernel


def _make_mlp_kernel(num_layers, B, N):
    inv_cnt = 1.0 / float(B * N)

    def kernel(feat_ref, *refs):
        param_refs = refs[:-1]      # 4 refs per layer: W, bias, gamma, beta
        out_ref = refs[-1]
        eps = jnp.float32(1e-5)

        feats = [feat_ref[b] for b in range(B)]          # per-batch [C, N]
        for i in range(num_layers):
            w = param_refs[4 * i][...]                   # [C_out, C_prev]
            bias = param_refs[4 * i + 1][...]            # [C_out, 1]
            gamma = param_refs[4 * i + 2][...]           # [C_out, 1]
            beta = param_refs[4 * i + 3][...]            # [C_out, 1]

            zs = [jnp.dot(w, f, preferred_element_type=jnp.float32) + bias
                  for f in feats]

            # Single-pass batch statistics over (B, N) per channel.
            s1 = zs[0].sum(axis=1, keepdims=True)
            s2 = (zs[0] * zs[0]).sum(axis=1, keepdims=True)
            for z in zs[1:]:
                s1 = s1 + z.sum(axis=1, keepdims=True)
                s2 = s2 + (z * z).sum(axis=1, keepdims=True)
            mean = s1 * inv_cnt
            var = jnp.maximum(s2 * inv_cnt - mean * mean, 0.0)

            # Fold BN into one per-channel scale/shift (rsqrt on tiny vector).
            scale = gamma * jax.lax.rsqrt(var + eps)     # [C_out, 1]
            shift = beta - mean * scale
            feats = [jnp.maximum(z * scale + shift, 0.0) for z in zs]   # ReLU

        for b in range(B):
            out_ref[b] = feats[b]

    return kernel


def pointnet_fp_forward(xyz1, xyz2, points1, points2, params):
    """xyz1 [B,3,N], xyz2 [B,3,S], points1 [B,D1,N], points2 [B,D2,S]."""
    B, _, N = xyz1.shape
    S = xyz2.shape[2]
    D1 = points1.shape[1]
    D2 = points2.shape[1]
    c_in = D1 + D2
    c_in_pad = ((c_in + 7) // 8) * 8
    c_last = params[-1][0].shape[0]

    # TODO(synk): the module's degenerate repeat branch (taken when
    # points2.shape[1] == 1 due to its unusual shape unpacking) is not
    # implemented; this covers the general three_nn/three_interpolate path.

    # N-tile for the interp stage (full N for small inputs, 128-multiples
    # otherwise so all stores/loads stay lane-dense).
    tn = N
    for cand in (512, 256, 128):
        if N % cand == 0:
            tn = cand
            break
    n_t = N // tn

    # Tiny wrapper-side transpose so the kernel never relayouts xyz2.
    xyz2_t = jnp.transpose(xyz2, (0, 2, 1))              # [B, S, 3]

    feat = pl.pallas_call(
        _make_interp_kernel(D1, D2, c_in_pad),
        out_shape=jax.ShapeDtypeStruct((B, c_in_pad, N), jnp.float32),
        grid=(B, n_t),
        in_specs=[
            pl.BlockSpec((1, 3, tn), lambda b, j: (b, 0, j)),
            pl.BlockSpec((1, S, 3), lambda b, j: (b, 0, 0)),
            pl.BlockSpec((1, D1, tn), lambda b, j: (b, 0, j)),
            pl.BlockSpec((1, D2, S), lambda b, j: (b, 0, 0)),
        ],
        out_specs=pl.BlockSpec((1, c_in_pad, tn), lambda b, j: (b, 0, j)),
        compiler_params=pltpu.CompilerParams(
            dimension_semantics=("parallel", "parallel")),
    )(xyz1, xyz2_t, points1, points2)

    # Pad the first conv weight's input channels with zero columns to match
    # the padded feature slab; later layers already have nice channel counts.
    flat = []
    for li, (w, b, g, bt) in enumerate(params):
        if li == 0 and c_in_pad > c_in:
            w = jnp.pad(w, ((0, 0), (0, c_in_pad - c_in)))
        flat.extend([w, b, g, bt])

    # TODO(synk): BatchNorm uses global (B, N) statistics, so the MLP stage is
    # a single untiled call; very large B*N would need a tiled two-pass
    # (stats-accumulate + apply) pipeline.
    n_in = 1 + len(flat)
    out = pl.pallas_call(
        _make_mlp_kernel(len(params), B, N),
        out_shape=jax.ShapeDtypeStruct((B, c_last, N), jnp.float32),
        in_specs=[pl.BlockSpec(memory_space=pltpu.MemorySpace.VMEM)] * n_in,
        out_specs=pl.BlockSpec(memory_space=pltpu.MemorySpace.VMEM),
    )(feat, *flat)
    return out


def reference_forward(xyz1, xyz2, points1, points2, params):
    """Pure-JAX reference mirroring the PyTorch forward (training-mode BN)."""
    B, _, N = xyz1.shape
    S = xyz2.shape[2]
    x1 = jnp.transpose(xyz1, (0, 2, 1))                                  # [B,N,3]
    x2 = jnp.transpose(xyz2, (0, 2, 1))                                  # [B,S,3]
    d2 = jnp.sum((x1[:, :, None, :] - x2[:, None, :, :]) ** 2, axis=-1)  # [B,N,S]
    neg_top, idx = jax.lax.top_k(-d2, 3)
    dist = -neg_top                                                      # [B,N,3]
    recip = 1.0 / (dist + 1e-8)
    norm = jnp.sum(recip, axis=2, keepdims=True)
    weight = recip / norm                                                # [B,N,3]
    onehot = (idx[..., None] == jnp.arange(S)).astype(jnp.float32)       # [B,N,3,S]
    wmat = jnp.sum(weight[..., None] * onehot, axis=2)                   # [B,N,S]
    interp = jnp.einsum('bds,bns->bdn', points2, wmat)                   # [B,D2,N]
    feat = jnp.concatenate([points1, interp], axis=1)
    for (w, b, gamma, beta) in params:
        z = jnp.einsum('oc,bcn->bon', w, feat) + b[None]
        mean = jnp.mean(z, axis=(0, 2), keepdims=True)
        var = jnp.mean((z - mean) ** 2, axis=(0, 2), keepdims=True)
        z = (z - mean) / jnp.sqrt(var + 1e-5) * gamma[None] + beta[None]
        feat = jnp.maximum(z, 0.0)
    return feat


if __name__ == "__main__":
    key = jax.random.PRNGKey(0)
    B, N, S = 2, 16, 8
    D1, D2 = 4, 8
    mlp = [32, 16]
    in_channel = D1 + D2

    keys = jax.random.split(key, 5)
    xyz1 = jax.random.normal(keys[0], (B, 3, N), jnp.float32)
    xyz2 = jax.random.normal(keys[1], (B, 3, S), jnp.float32)
    points1 = jax.random.normal(keys[2], (B, D1, N), jnp.float32)
    points2 = jax.random.normal(keys[3], (B, D2, S), jnp.float32)

    # Deterministic parameter init (Conv1d weight/bias; BN gamma=1, beta=0).
    params = []
    last = in_channel
    pk = keys[4]
    for c_out in mlp:
        pk, k_w, k_b = jax.random.split(pk, 3)
        w = jax.random.normal(k_w, (c_out, last), jnp.float32) / jnp.sqrt(float(last))
        b = jax.random.normal(k_b, (c_out, 1), jnp.float32) * 0.1
        gamma = jnp.ones((c_out, 1), jnp.float32)
        beta = jnp.zeros((c_out, 1), jnp.float32)
        params.append((w, b, gamma, beta))
        last = c_out

    out = pointnet_fp_forward(xyz1, xyz2, points1, points2, params)
    out = jax.block_until_ready(out)

    ref = reference_forward(xyz1, xyz2, points1, points2, params)
    assert out.shape == (B, mlp[-1], N), out.shape
    assert bool(jnp.all(jnp.isfinite(out)))
    max_err = float(jnp.max(jnp.abs(out - ref)))
    assert bool(jnp.allclose(out, ref, atol=2e-2, rtol=2e-2)), max_err
    print("KERNEL_OK")
</pallas_src>

<mosaic_0001>
module attributes {stable_mosaic.version = 11 : i64} {
  func.func @kernel(%arg0: i32, %arg1: i32, %arg2: memref<1x3x16xf32, #tpu.memory_space<vmem>>, %arg3: memref<1x8x3xf32, #tpu.memory_space<vmem>>, %arg4: memref<1x4x16xf32, #tpu.memory_space<vmem>>, %arg5: memref<1x8x8xf32, #tpu.memory_space<vmem>>, %arg6: memref<1x16x16xf32, #tpu.memory_space<vmem>>) attributes {dimension_semantics = [#tpu.dimension_semantics<parallel>, #tpu.dimension_semantics<parallel>], iteration_bounds = array<i64: 2, 1>, scalar_prefetch = 0 : i64, scratch_operands = 0 : i64, tpu.core_type = #tpu.core_type<tc>, window_params = [{transform_indices = @transform_0, window_bounds = array<i64: 1, 3, 16>}, {transform_indices = @transform_1, window_bounds = array<i64: 1, 8, 3>}, {transform_indices = @transform_2, window_bounds = array<i64: 1, 4, 16>}, {transform_indices = @transform_3, window_bounds = array<i64: 1, 8, 8>}, {transform_indices = @transform_4, window_bounds = array<i64: 1, 16, 16>}]} {
    %c0 = arith.constant 0 : index
    %c0_0 = arith.constant 0 : index
    %c0_1 = arith.constant 0 : index
    %0 = vector.load %arg2[%c0, %c0_0, %c0_1] : memref<1x3x16xf32, #tpu.memory_space<vmem>>, vector<1x3x16xf32>
    %1 = vector.shape_cast %0 : vector<1x3x16xf32> to vector<3x16xf32>
    %c0_2 = arith.constant 0 : index
    %c0_3 = arith.constant 0 : index
    %c0_4 = arith.constant 0 : index
    %2 = vector.load %arg3[%c0_2, %c0_3, %c0_4] : memref<1x8x3xf32, #tpu.memory_space<vmem>>, vector<1x8x3xf32>
    %3 = vector.shape_cast %2 : vector<1x8x3xf32> to vector<8x3xf32>
    %cst = arith.constant dense<0.000000e+00> : vector<8x16xf32>
    %4 = tpu.matmul %3, %1, %cst {dimension_numbers = #tpu.dot_dimension_numbers<[1], [0], [0], [1], [0, 0, 1, 1], [], []>} : vector<8x3xf32>, vector<3x16xf32>, vector<8x16xf32> -> vector<8x16xf32>
    %5 = arith.mulf %1, %1 : vector<3x16xf32>
    %cst_5 = arith.constant dense<0.000000e+00> : vector<16xf32>
    %6 = vector.multi_reduction <add>, %5, %cst_5 [0] : vector<3x16xf32> to vector<16xf32>
    %7 = vector.shape_cast %6 : vector<16xf32> to vector<1x16xf32>
    %8 = arith.mulf %3, %3 : vector<8x3xf32>
    %cst_6 = arith.constant dense<0.000000e+00> : vector<8xf32>
    %9 = vector.multi_reduction <add>, %8, %cst_6 [1] : vector<8x3xf32> to vector<8xf32>
    %10 = vector.shape_cast %9 : vector<8xf32> to vector<8x1xf32>
    %11 = vector.broadcast %10 : vector<8x1xf32> to vector<8x16xf32>
    %12 = vector.broadcast %7 : vector<1x16xf32> to vector<8x16xf32>
    %13 = arith.addf %11, %12 : vector<8x16xf32>
    %cst_7 = arith.constant 2.000000e+00 : f32
    %14 = vector.broadcast %cst_7 : f32 to vector<8x16xf32>
    %15 = arith.mulf %14, %4 : vector<8x16xf32>
    %16 = arith.subf %13, %15 : vector<8x16xf32>
    %cst_8 = arith.constant 0.000000e+00 : f32
    %17 = vector.broadcast %cst_8 : f32 to vector<8x16xf32>
    %18 = arith.maximumf %16, %17 : vector<8x16xf32>
    %19 = tpu.iota {dimensions = array<i32: 0>} : vector<8x16xi32>
    %cst_9 = arith.constant 0.000000e+00 : f32
    %20 = vector.broadcast %cst_9 : f32 to vector<1x16xf32>
    %cst_10 = arith.constant 0.000000e+00 : f32
    %21 = vector.broadcast %cst_10 : f32 to vector<8x16xf32>
    %cst_11 = arith.constant dense<0x7F800000> : vector<16xf32>
    %22 = vector.multi_reduction <minimumf>, %18, %cst_11 [0] : vector<8x16xf32> to vector<16xf32>
    %23 = vector.shape_cast %22 : vector<16xf32> to vector<1x16xf32>
    %24 = vector.broadcast %23 : vector<1x16xf32> to vector<8x16xf32>
    %25 = arith.cmpf ole, %18, %24 : vector<8x16xf32>
    %c8_i32 = arith.constant 8 : i32
    %26 = vector.broadcast %c8_i32 : i32 to vector<8x16xi32>
    %27 = arith.select %25, %19, %26 : vector<8x16xi1>, vector<8x16xi32>
    %cst_12 = arith.constant dense<2147483647> : vector<16xi32>
    %28 = vector.multi_reduction <minsi>, %27, %cst_12 [0] : vector<8x16xi32> to vector<16xi32>
    %29 = vector.shape_cast %28 : vector<16xi32> to vector<1x16xi32>
    %30 = vector.broadcast %29 : vector<1x16xi32> to vector<8x16xi32>
    %31 = arith.cmpi eq, %19, %30 : vector<8x16xi32>
    %cst_13 = arith.constant 9.99999993E-9 : f32
    %32 = vector.broadcast %cst_13 : f32 to vector<1x16xf32>
    %33 = arith.addf %23, %32 : vector<1x16xf32>
    %34 = tpu.reciprocal %33 {approx = true} : vector<1x16xf32> -> vector<1x16xf32>
    %35 = arith.addf %20, %34 : vector<1x16xf32>
    %36 = arith.extui %31 : vector<8x16xi1> to vector<8x16xi32>
    %37 = arith.sitofp %36 : vector<8x16xi32> to vector<8x16xf32>
    %38 = vector.broadcast %34 : vector<1x16xf32> to vector<8x16xf32>
    %39 = arith.mulf %38, %37 : vector<8x16xf32>
    %40 = arith.addf %21, %39 : vector<8x16xf32>
    %cst_14 = arith.constant 1.000000e+30 : f32
    %41 = vector.broadcast %cst_14 : f32 to vector<8x16xf32>
    %42 = arith.select %31, %41, %18 : vector<8x16xi1>, vector<8x16xf32>
    %cst_15 = arith.constant dense<0x7F800000> : vector<16xf32>
    %43 = vector.multi_reduction <minimumf>, %42, %cst_15 [0] : vector<8x16xf32> to vector<16xf32>
    %44 = vector.shape_cast %43 : vector<16xf32> to vector<1x16xf32>
    %45 = vector.broadcast %44 : vector<1x16xf32> to vector<8x16xf32>
    %46 = arith.cmpf ole, %42, %45 : vector<8x16xf32>
    %c8_i32_16 = arith.constant 8 : i32
    %47 = vector.broadcast %c8_i32_16 : i32 to vector<8x16xi32>
    %48 = arith.select %46, %19, %47 : vector<8x16xi1>, vector<8x16xi32>
    %cst_17 = arith.constant dense<2147483647> : vector<16xi32>
    %49 = vector.multi_reduction <minsi>, %48, %cst_17 [0] : vector<8x16xi32> to vector<16xi32>
    %50 = vector.shape_cast %49 : vector<16xi32> to vector<1x16xi32>
    %51 = vector.broadcast %50 : vector<1x16xi32> to vector<8x16xi32>
    %52 = arith.cmpi eq, %19, %51 : vector<8x16xi32>
    %cst_18 = arith.constant 9.99999993E-9 : f32
    %53 = vector.broadcast %cst_18 : f32 to vector<1x16xf32>
    %54 = arith.addf %44, %53 : vector<1x16xf32>
    %55 = tpu.reciprocal %54 {approx = true} : vector<1x16xf32> -> vector<1x16xf32>
    %56 = arith.addf %35, %55 : vector<1x16xf32>
    %57 = arith.extui %52 : vector<8x16xi1> to vector<8x16xi32>
    %58 = arith.sitofp %57 : vector<8x16xi32> to vector<8x16xf32>
    %59 = vector.broadcast %55 : vector<1x16xf32> to vector<8x16xf32>
    %60 = arith.mulf %59, %58 : vector<8x16xf32>
    %61 = arith.addf %40, %60 : vector<8x16xf32>
    %cst_19 = arith.constant 1.000000e+30 : f32
    %62 = vector.broadcast %cst_19 : f32 to vector<8x16xf32>
    %63 = arith.select %52, %62, %42 : vector<8x16xi1>, vector<8x16xf32>
    %cst_20 = arith.constant dense<0x7F800000> : vector<16xf32>
    %64 = vector.multi_reduction <minimumf>, %63, %cst_20 [0] : vector<8x16xf32> to vector<16xf32>
    %65 = vector.shape_cast %64 : vector<16xf32> to vector<1x16xf32>
    %66 = vector.broadcast %65 : vector<1x16xf32> to vector<8x16xf32>
    %67 = arith.cmpf ole, %63, %66 : vector<8x16xf32>
    %c8_i32_21 = arith.constant 8 : i32
    %68 = vector.broadcast %c8_i32_21 : i32 to vector<8x16xi32>
    %69 = arith.select %67, %19, %68 : vector<8x16xi1>, vector<8x16xi32>
    %cst_22 = arith.constant dense<2147483647> : vector<16xi32>
    %70 = vector.multi_reduction <minsi>, %69, %cst_22 [0] : vector<8x16xi32> to vector<16xi32>
    %71 = vector.shape_cast %70 : vector<16xi32> to vector<1x16xi32>
    %72 = vector.broadcast %71 : vector<1x16xi32> to vector<8x16xi32>
    %73 = arith.cmpi eq, %19, %72 : vector<8x16xi32>
    %cst_23 = arith.constant 9.99999993E-9 : f32
    %74 = vector.broadcast %cst_23 : f32 to vector<1x16xf32>
    %75 = arith.addf %65, %74 : vector<1x16xf32>
    %76 = tpu.reciprocal %75 {approx = true} : vector<1x16xf32> -> vector<1x16xf32>
    %77 = arith.addf %56, %76 : vector<1x16xf32>
    %78 = arith.extui %73 : vector<8x16xi1> to vector<8x16xi32>
    %79 = arith.sitofp %78 : vector<8x16xi32> to vector<8x16xf32>
    %80 = vector.broadcast %76 : vector<1x16xf32> to vector<8x16xf32>
    %81 = arith.mulf %80, %79 : vector<8x16xf32>
    %82 = arith.addf %61, %81 : vector<8x16xf32>
    %83 = tpu.reciprocal %77 {approx = true} : vector<1x16xf32> -> vector<1x16xf32>
    %84 = vector.broadcast %83 : vector<1x16xf32> to vector<8x16xf32>
    %85 = arith.mulf %82, %84 : vector<8x16xf32>
    %c0_24 = arith.constant 0 : index
    %c0_25 = arith.constant 0 : index
    %c0_26 = arith.constant 0 : index
    %86 = vector.load %arg5[%c0_24, %c0_25, %c0_26] : memref<1x8x8xf32, #tpu.memory_space<vmem>>, vector<1x8x8xf32>
    %87 = vector.shape_cast %86 : vector<1x8x8xf32> to vector<8x8xf32>
    %cst_27 = arith.constant dense<0.000000e+00> : vector<8x16xf32>
    %88 = tpu.matmul %87, %85, %cst_27 {dimension_numbers = #tpu.dot_dimension_numbers<[1], [0], [0], [1], [0, 0, 1, 1], [], []>} : vector<8x8xf32>, vector<8x16xf32>, vector<8x16xf32> -> vector<8x16xf32>
    %c0_28 = arith.constant 0 : index
    %c0_29 = arith.constant 0 : index
    %c0_30 = arith.constant 0 : index
    %89 = vector.load %arg4[%c0_28, %c0_29, %c0_30] : memref<1x4x16xf32, #tpu.memory_space<vmem>>, vector<1x4x16xf32>
    %90 = vector.shape_cast %89 : vector<1x4x16xf32> to vector<4x16xf32>
    %c0_31 = arith.constant 0 : index
    %c0_32 = arith.constant 0 : index
    %c0_33 = arith.constant 0 : index
    %91 = vector.load %arg6[%c0_31, %c0_32, %c0_33] : memref<1x16x16xf32, #tpu.memory_space<vmem>>, vector<1x4x16xf32>
    %92 = vector.shape_cast %91 : vector<1x4x16xf32> to vector<4x16xf32>
    %93 = vector.shape_cast %90 : vector<4x16xf32> to vector<1x4x16xf32>
    tpu.vector_store %arg6[%c0_31, %c0_32, %c0_33], %93 {strides = array<i32>} : memref<1x16x16xf32, #tpu.memory_space<vmem>>, vector<1x4x16xf32>,
    %c0_34 = arith.constant 0 : index
    %c4 = arith.constant 4 : index
    %c0_35 = arith.constant 0 : index
    %94 = vector.load %arg6[%c0_34, %c4, %c0_35] : memref<1x16x16xf32, #tpu.memory_space<vmem>>, vector<1x8x16xf32>
    %95 = vector.shape_cast %94 : vector<1x8x16xf32> to vector<8x16xf32>
    %96 = vector.shape_cast %88 : vector<8x16xf32> to vector<1x8x16xf32>
    tpu.vector_store %arg6[%c0_34, %c4, %c0_35], %96 {strides = array<i32>} : memref<1x16x16xf32, #tpu.memory_space<vmem>>, vector<1x8x16xf32>,
    %cst_36 = arith.constant 0.000000e+00 : f32
    %97 = vector.broadcast %cst_36 : f32 to vector<4x16xf32>
    %c0_37 = arith.constant 0 : index
    %c12 = arith.constant 12 : index
    %c0_38 = arith.constant 0 : index
    %98 = vector.load %arg6[%c0_37, %c12, %c0_38] : memref<1x16x16xf32, #tpu.memory_space<vmem>>, vector<1x4x16xf32>
    %99 = vector.shape_cast %98 : vector<1x4x16xf32> to vector<4x16xf32>
    %100 = vector.shape_cast %97 : vector<4x16xf32> to vector<1x4x16xf32>
    tpu.vector_store %arg6[%c0_37, %c12, %c0_38], %100 {strides = array<i32>} : memref<1x16x16xf32, #tpu.memory_space<vmem>>, vector<1x4x16xf32>,
    return
  }
  func.func @transform_0(%arg0: i32, %arg1: i32) -> (i32, i32, i32) {
    %c0_i32 = arith.constant 0 : i32
    %c0_i32_0 = arith.constant 0 : i32
    return %arg0, %c0_i32, %arg1 : i32, i32, i32
  }
  func.func @transform_1(%arg0: i32, %arg1: i32) -> (i32, i32, i32) {
    %c0_i32 = arith.constant 0 : i32
    %c0_i32_0 = arith.constant 0 : i32
    %c0_i32_1 = arith.constant 0 : i32
    return %arg0, %c0_i32, %c0_i32_0 : i32, i32, i32
  }
  func.func @transform_2(%arg0: i32, %arg1: i32) -> (i32, i32, i32) {
    %c0_i32 = arith.constant 0 : i32
    %c0_i32_0 = arith.constant 0 : i32
    return %arg0, %c0_i32, %arg1 : i32, i32, i32
  }
  func.func @transform_3(%arg0: i32, %arg1: i32) -> (i32, i32, i32) {
    %c0_i32 = arith.constant 0 : i32
    %c0_i32_0 = arith.constant 0 : i32
    %c0_i32_1 = arith.constant 0 : i32
    return %arg0, %c0_i32, %c0_i32_0 : i32, i32, i32
  }
  func.func @transform_4(%arg0: i32, %arg1: i32) -> (i32, i32, i32) {
    %c0_i32 = arith.constant 0 : i32
    %c0_i32_0 = arith.constant 0 : i32
    return %arg0, %c0_i32, %arg1 : i32, i32, i32
  }
}

</mosaic_0001>

<bundles_post_ra>
// kernel: tpu_custom_call.1
= control target key start
LH: loop header
LB: loop body
LE: loop exit
PB: predicated region body
PF: predicated region fallthrough
CT: control target
= control target key end

     0   :  { %9 = vsyncpa [#allocation3], 0  ;;  %s1043_s0 = inlined_call_operand.vmem [shape: f32[2,3,16], index: 0, kind: input, shape index: {}]   ;;  %s1044_s1 = inlined_call_operand.vmem [shape: f32[2,8,3], index: 1, kind: input, shape index: {}]   ;;  %s1045_s2 = inlined_call_operand.vmem [shape: f32[2,4,16], index: 2, kind: input, shape index: {}]   ;;  %s1046_s3 = inlined_call_operand.vmem [shape: f32[2,8,8], index: 3, kind: input, shape index: {}]   ;;  %s1047_s4 = inlined_call_operand.hbm [shape: f32[2,16,16], index: 4, kind: output, shape index: {}]  }
   0x1   :  { %11 = vsyncpa [#allocation3 + $0x1], 0  ;;  %s885_s15 = smov 0   ;;  %s887_s16 = smov 0  }
   0x2   :  { %s889_s17 = smov 0   ;;  %s891_s18 = smov 0  }
   0x3   :  { %s893_s19 = smov 0   ;;  %s895_s20 = smov 0  }
   0x4 LB: > { %s674_s21 = sadd.s32 4294967295, %s853_s20   ;;  %s675_s22 = sadd.s32 4294967294, %s853_s20   ;;  %s853_s20 = sphi %s895_s20, %s17_s20   ;;  %s849_s19 = sphi %s893_s19, %s1054_s19   ;;  %s845_s18 = sphi %s891_s18, %s1053_s18   ;;  %s841_s17 = sphi %s889_s17, %s1052_s17   ;;  %s837_s16 = sphi %s887_s16, %s1051_s16   ;;  %s833_s15 = sphi %s885_s15, %s1050_s15  }
   0x5   : > { %s29_s23 = sadd.s32 1, %s849_s19  ;;  %s146_s24 = sadd.s32 1, %s841_s17 }
   0x6   : > { %p31_p0 = scmp.ge.s32.totalorder %s29_s23, 2  ;;  %p156_p1 = scmp.ne.s32.totalorder %s841_s17, %s837_s16 }
   0x7   : > { %p157_p2 = scmp.eq.s32.totalorder %s674_s21, 1  ;;  %p162_p3 = scmp.ne.s32.totalorder %s837_s16, %s833_s15 }
   0x8   : > { %s1056_s23 = smov (%p31_p0, %s29_s23), 0  ;;  %p163_p5 = scmp.eq.s32.totalorder %s675_s22, 1 }
   0x9   : > { %p925_p4 = por %p157_p2, %p156_p1  ;;  %s141_s26 = ssub.s32 %s849_s19, %s1056_s23 }
   0xa   : > { %p678_p6 = scmp.ge.s32.totalorder %s853_s20, 1  ;;  %p144_p7 = scmp.eq.s32.totalorder %s141_s26, 0 }
   0xb   : > { %p932_p8 = por %p163_p5, %p162_p3  ;;  %p215_p9 = scmp.lt.s32.totalorder %s853_s20, 3 }
   0xc   : > { %s938_s28 = scalar_select %p144_p7, %s841_s17, %s146_s24  }
   0xd   : > { %p216_p10 = pnand %p678_p6, %p215_p9 }
   0xe   : > { %p258_p11 = scmp.lt.s32.totalorder (!%p216_p10), %s845_s18, 1  ;;  %s255_s21 = sand.u32 (!%p216_p10), 1, %s837_s16  }
   0xf   : > { %219 = sbr.rel (%p216_p10) target bundleno = 541 (0x21d), region = 36  ;;  %s679_s6 = sshll.u32 (!%p216_p10), %s255_s21, 4 }
  0x10   : > { %s257_s7 = scalar_lea.vmem (!%p216_p10), [#allocation2], %s679_s6 }
  0x14   : > { %v855_v0 = vmov 0.0   ;;  %vm856_vm0 = vmmov 0   ;;  %s944_s29 = scalar_select %p258_p11, %s845_s18, 1  ;;  %vm286_vm1 = vcmask 1042432   ;;  %vm282_vm2 = vcmask 23552  }
  0x15   : > { %700 = vmatprep.subr.mxu0 %v855_v0  ;;  %702 = vmatprep.mubr.msk.f32.mxu0 %vm856_vm0, %v855_v0  ;;  %vm361_vm3 = vcmask 124928   ;;  %vm379_vm4 = vcmask 130048   ;;  %v377_v24 = vlaneseq }
  0x16   : > { %705 = vmatprep.subr.mxu1 %v855_v0  ;;  %707 = vmatprep.mubr.msk.f32.mxu1 %vm856_vm0, %v855_v0  ;;  %s680_s30 = sshll.u32 %s944_s29, 2  ;;  %s681_s5 = sshll.u32 %s944_s29, 3 }
  0x17   : > { %s264_s8 = scalar_lea.vmem %s1043_s0, %s680_s30  ;;  %s268_s11 = scalar_lea.vmem %s1044_s1, %s681_s5  ;;  %v961_v27 = vshrl.u32 %v377_v24, 7 }
  0x18   : > { %v280_v1 = vld [vmem:[%s264_s8] sm:$0x7]  ;;  %s279_s14 = scalar_lea.vmem %s1046_s3, %s681_s5  ;;  %s275_s26 = scalar_lea.vmem %s1045_s2, %s680_s30 }
  0x19   : > { %701 = vmatpush3.msk.msra.mxu0 %vm286_vm1, %v280_v1  ;;  %v281_v2 = vld [vmem:[%s268_s11] sm:$0xff]  ;;  %v360_v5 = vmul.f32 %v280_v1, %v280_v1  ;;  %s560_s5 = sshll.u32 %s257_s7, 4  ;;  %s695_s8 = sshll.u32 %s845_s18, 8  ;;  %s990_s5 = int_to_ptr.vmem [resolvable:$true] %s560_s5 }
  0x1a   : > { %703 = vmatmul.mubr.msk.f32.vlgmr.msra.gmra.mxu0 %vm282_vm2, %v281_v2  ;;  %v369_v3 = vmul.f32 %v281_v2, %v281_v2  ;;  %v465_v24 = vld [vmem:[%s279_s14] sm:$0xff]  ;;  %s995_s29 = scalar_lea.hbm %s1047_s4, %s695_s8  ;;  %s998_s30 = scalar_lea.sflag [#allocation3], %s255_s21 }
  0x1b   : > { %v362_v6 = vsel %vm361_vm3, %v360_v5, 0.0  ;;  %s777_s11 = scalar_lea.vmem %s990_s5, 256  ;;  %s857_s18 = smov [#allocation2]  }
  0x1c   : > { %v370_v4 = vsel %vm282_vm2, %v369_v3, 0.0  ;;  %v363_v7 = vrot.slane %v362_v6, 4  ;;  %p778_p12 = scmp.ne.s32.totalorder %s990_s5, %s777_s11  ;;  %s781_s12 = sshll.u32 %s857_s18, 4  ;;  %s782_s12 = int_to_ptr.vmem [resolvable:$false] %s781_s12 }
  0x1d   : > { %371 = vadd.xlane.f32.xlu0 %v370_v4  ;;  %s783_s13 = scalar_lea.vmem %s782_s12, 512  ;;  %p784_p1 = scmp.lt.s32.totalorder %s990_s5, %s782_s12 }
  0x1e   : > { %v364_v8 = vadd.f32 %v363_v7, %v362_v6  ;;  %p779_p13 = pnand %p778_p12, %p925_p4  ;;  %p785_p2 = scmp.lt.s32.totalorder %s783_s13, %s777_s11 }
  0x20   : > { %v365_v9 = vrot.slane %v364_v8, 2  ;;  %p780_p0 = pneg %p779_p13  ;;  %p786_p3 = por %p785_p2, %p784_p1 }
  0x22   : > { %v366_v10 = vadd.f32 %v365_v9, %v364_v8  ;;  %p787_p5 = pnand %p786_p3, %p780_p0 }
  0x24   : > { %v367_v11 = vrot.slane %v366_v10, 1 }
  0x26   : > { %v368_v12 = vadd.f32 %v367_v11, %v366_v10 }
  0xa6   : > { %v372_v13 = vpop.xlane.xlu0 %371 }
  0xa7   : > { %v373_v14 = vadd.f32 %v372_v13, %v368_v12 }
  0xda   : > { %v356_v15 = vpop.f32.mrf.mxu0 }
  0xdb   : > { %v374_v16 = vmul.f32 2.0, %v356_v15 }
  0xdc   : > { %v704_v17 = vpop.f32.mrf.mxu0 }
  0xdd   : > { %v375_v18 = vsub.f32 %v373_v14, %v374_v16 }
  0xdf   : > { %v376_v19 = vmax.f32 %v375_v18, 0.0 }
  0xe1   : > { %v380_v20 = vsel %vm379_vm4, %v376_v19, inf }
  0xe2   : > { %v381_v21 = vrot.slane %v380_v20, 4 }
  0xe4   : > { %v382_v22 = vmin.f32 %v380_v20, %v381_v21 }
  0xe6   : > { %v383_v23 = vrot.slane %v382_v22, 2 }
  0xe8   : > { %v384_v25 = vmin.f32 %v382_v22, %v383_v23 }
  0xea   : > { %v385_v26 = vrot.slane %v384_v25, 1 }
  0xec   : > { %v386_v28 = vmin.f32 %v384_v25, %v385_v26  ;;  %v540_v25 = vld [vmem:[%s275_s26] sm:$0xf] }
  0xee   : > { %vm387_vm5 = vcmp.le.f32.partialorder %v376_v19, %v386_v28  ;;  %v400_v29 = vadd.f32 1e-08, %v386_v28 }
  0xef   : > { %v388_v30 = vsel %vm387_vm5, %v961_v27, 8  ;;  %vm466_vm5 = vcmask 64512  }
  0xf0   : > { %v389_v31 = vsel %vm379_vm4, %v388_v30, 2147483647  ;;  %769 = vrcp.f32 %v400_v29 }
  0xf1   : > { %v390_v32 = vrot.slane %v389_v31, 4 }
  0xf3   : > { %vm391_vm6 = vcmp.lt.s32.totalorder %v389_v31, %v390_v32 }
  0xf4   : > { %v392_v33 = vsel %vm391_vm6, %v389_v31, %v390_v32  ;;  %vm541_vm6 = vcmask 125952  }
  0xf5   : > { %v393_v34 = vrot.slane %v392_v33, 2  ;;  %542 = vst.msk [vmem:[%s257_s7] sm:$0xf] %vm541_vm6, %v540_v25  ;;  %544 = vst.msk [vmem:[%s257_s7 + $0xc] sm:$0xf] %vm541_vm6, %v855_v0 }
  0xf7   : > { %vm394_vm7 = vcmp.lt.s32.totalorder %v392_v33, %v393_v34 }
  0xf8   : > { %v395_v35 = vsel %vm394_vm7, %v392_v33, %v393_v34 }
  0xf9   : > { %v396_v36 = vrot.slane %v395_v35, 1 }
  0xfb   : > { %vm397_vm8 = vcmp.lt.s32.totalorder %v395_v35, %v396_v36 }
  0xfc   : > { %v398_v37 = vsel %vm397_vm8, %v395_v35, %v396_v36 }
  0xfd   : > { %v770_v38 = vpop.eup %769  ;;  %vm399_vm9 = vcmp.eq.s32.totalorder %v961_v27, %v398_v37 }
  0xfe   : > { %v407_v39 = vsel %vm399_vm9, 1e+30, %v376_v19  ;;  %v686_v40 = vsel %vm399_vm9, 1.0, %v855_v0 }
  0xff   : > { %v408_v41 = vsel %vm379_vm4, %v407_v39, inf  ;;  %v405_v42 = vmul.f32 %v770_v38, %v686_v40 }
 0x100   : > { %v409_v43 = vrot.slane %v408_v41, 4 }
 0x102   : > { %v410_v44 = vmin.f32 %v408_v41, %v409_v43 }
 0x104   : > { %v411_v45 = vrot.slane %v410_v44, 2 }
 0x106   : > { %v412_v46 = vmin.f32 %v410_v44, %v411_v45 }
 0x108   : > { %v413_v47 = vrot.slane %v412_v46, 1 }
 0x10a   : > { %v414_v48 = vmin.f32 %v412_v46, %v413_v47 }
 0x10c   : > { %vm415_vm10 = vcmp.le.f32.partialorder %v407_v39, %v414_v48  ;;  %v428_v49 = vadd.f32 1e-08, %v414_v48 }
 0x10d   : > { %v416_v50 = vsel %vm415_vm10, %v961_v27, 8 }
 0x10e   : > { %v417_v51 = vsel %vm379_vm4, %v416_v50, 2147483647  ;;  %771 = vrcp.f32 %v428_v49 }
 0x10f   : > { %v418_v52 = vrot.slane %v417_v51, 4 }
 0x111   : > { %vm419_vm11 = vcmp.lt.s32.totalorder %v417_v51, %v418_v52 }
 0x112   : > { %v420_v53 = vsel %vm419_vm11, %v417_v51, %v418_v52 }
 0x113   : > { %v421_v54 = vrot.slane %v420_v53, 2 }
 0x115   : > { %vm422_vm12 = vcmp.lt.s32.totalorder %v420_v53, %v421_v54 }
 0x116   : > { %v423_v55 = vsel %vm422_vm12, %v420_v53, %v421_v54 }
 0x117   : > { %v424_v56 = vrot.slane %v423_v55, 1 }
 0x119   : > { %vm425_vm13 = vcmp.lt.s32.totalorder %v423_v55, %v424_v56 }
 0x11a   : > { %v426_v57 = vsel %vm425_vm13, %v423_v55, %v424_v56 }
 0x11b   : > { %v772_v58 = vpop.eup %771  ;;  %vm427_vm14 = vcmp.eq.s32.totalorder %v961_v27, %v426_v57 }
 0x11c   : > { %v687_v59 = vsel %vm427_vm14, 1.0, %v855_v0  ;;  %v435_v60 = vsel %vm427_vm14, 1e+30, %v407_v39  ;;  %v430_v15 = vadd.f32 %v772_v58, %v770_v38 }
 0x11d   : > { %v433_v61 = vmul.f32 %v772_v58, %v687_v59  ;;  %v436_v62 = vsel %vm379_vm4, %v435_v60, inf }
 0x11e   : > { %v437_v63 = vrot.slane %v436_v62, 4 }
 0x11f   : > { %v434_v1 = vadd.f32 %v433_v61, %v405_v42 }
 0x120   : > { %v438_v2 = vmin.f32 %v436_v62, %v437_v63 }
 0x122   : > { %v439_v3 = vrot.slane %v438_v2, 2 }
 0x124   : > { %v440_v4 = vmin.f32 %v438_v2, %v439_v3 }
 0x126   : > { %v441_v5 = vrot.slane %v440_v4, 1 }
 0x128   : > { %v442_v6 = vmin.f32 %v440_v4, %v441_v5 }
 0x12a   : > { %vm443_vm15 = vcmp.le.f32.partialorder %v435_v60, %v442_v6  ;;  %v456_v7 = vadd.f32 1e-08, %v442_v6 }
 0x12b   : > { %v444_v8 = vsel %vm443_vm15, %v961_v27, 8 }
 0x12c   : > { %v445_v9 = vsel %vm379_vm4, %v444_v8, 2147483647  ;;  %773 = vrcp.f32 %v456_v7 }
 0x12d   : > { %v446_v10 = vrot.slane %v445_v9, 4 }
 0x12f   : > { %vm447_vm0 = vcmp.lt.s32.totalorder %v445_v9, %v446_v10 }
 0x130   : > { %v448_v11 = vsel %vm447_vm0, %v445_v9, %v446_v10 }
 0x131   : > { %v449_v12 = vrot.slane %v448_v11, 2 }
 0x133   : > { %vm450_vm1 = vcmp.lt.s32.totalorder %v448_v11, %v449_v12 }
 0x134   : > { %v451_v13 = vsel %vm450_vm1, %v448_v11, %v449_v12 }
 0x135   : > { %v452_v14 = vrot.slane %v451_v13, 1 }
 0x137   : > { %vm453_vm2 = vcmp.lt.s32.totalorder %v451_v13, %v452_v14 }
 0x138   : > { %v454_v16 = vsel %vm453_vm2, %v451_v13, %v452_v14 }
 0x139   : > { %v774_v17 = vpop.eup %773  ;;  %vm455_vm3 = vcmp.eq.s32.totalorder %v961_v27, %v454_v16 }
 0x13a   : > { %v458_v18 = vadd.f32 %v774_v17, %v430_v15  ;;  %v688_v19 = vsel %vm455_vm3, 1.0, %v855_v0 }
 0x13b   : > { %v461_v20 = vmul.f32 %v774_v17, %v688_v19 }
 0x13c   : > { %775 = vrcp.f32 %v458_v18 }
 0x13d   : > { %v462_v21 = vadd.f32 %v461_v20, %v434_v1 }
 0x149   : > { %v776_v22 = vpop.eup %775 }
 0x14a   : > { %v464_v23 = vmul.f32 %v776_v22, %v462_v21 }
 0x14c   : > { %706 = vmatpush3.msra.mxu1 %v464_v23 }
 0x14d   : > { %708 = vmatmul.mubr.msk.f32.vlgmr.msra.gmra.mxu1 %vm466_vm5, %v465_v24 }
 0x20d   : > { %v536_v26 = vpop.f32.mrf.mxu1 }
 0x20e   : > { %543 = vst.msk [vmem:[%s257_s7 + $0x4] sm:$0xff] %vm379_vm4, %v536_v26 }
 0x20f   : > { %v709_v27 = vpop.f32.mrf.mxu1 }
 0x210   : > { %790 = shalt.err (!%p787_p5)
}
 0x211   : > { %s791_s14 = scalar_lea.hbm %s995_s29, 256  ;;  %s795_s24 = scalar_lea.hbm %s1047_s4, 512 }
 0x212   : > { %p792_p6 = scmp.ne.s32.totalorder %s995_s29, %s791_s14  ;;  %p796_p10 = scmp.lt.s32.totalorder %s995_s29, %s1047_s4 }
 0x213   : > { %p797_p11 = scmp.lt.s32.totalorder %s795_s24, %s791_s14 }
 0x214   : > { %p793_p7 = pnand %p792_p6, %p925_p4 }
 0x215   : > { %p798_p12 = por %p797_p11, %p796_p10 }
 0x216   : > { %p794_p9 = pneg %p793_p7 }
 0x218   : > { %p799_p13 = pnand %p798_p12, %p794_p9 }
 0x21a   : > { %802 = shalt.err (!%p799_p13)
}
 0x21b   : > { %s858_s7 = smov 128   ;;  %s859_s8 = smov 8  }
 0x21c   : > { %710 = dma.vmem_to_hbm [thread:$0]  (%p925_p4), %s990_s5, 256, %s995_s29, %s998_s30, %s858_s7, %s858_s7, %s859_s8  }
 0x21d PF: > { %p716_p0 = scmp.ge.s32.totalorder %s853_s20, 2  ;;  %s575_s9 = sand.u32 1, %s833_s15  }
 0x21e   : > { %s576_s10 = scalar_lea.sflag [#allocation3], %s575_s9 }
 0x21f   : > { %p713_p1 = pnand %p716_p0, %p932_p8 }
 0x221   : > { %p714_p2 = pneg %p713_p1 }
 0x223   : > { %828 = dma.done.wait (%p714_p2), %s576_s10, 256  }
 0x224   : > { %830 = vsyncadd (%p714_p2), %s576_s10, 4294967040  ;;  %s17_s20 = sadd.s32 1, %s853_s20   ;;  %s1050_s15 = smov %s837_s16 }
 0x225   : > { %p14_p3 = scmp.ge.s32.totalorder %s17_s20, 4   ;;  %s1051_s16 = smov %s841_s17 }
 0x226   : > { %s1052_s17 = smov %s938_s28  ;;  %s1053_s18 = smov %s849_s19 }
 0x227   : > { %s1054_s19 = smov %s1056_s23  ;;  %16 = sbr.rel (!%p14_p3) target bundleno = 4 (0x4), region = 80 }
 0x22c   :  { %581 = vsyncpa [#allocation3], 1 }
 0x22d   :  { %583 = vsyncpa [#allocation3 + $0x1], 1 }

</bundles_post_ra>
